<compile_context>
chip_gen: v5e
topology: v5e:2x2
jax: 0.10.0
libtpu: 0.0.40
codegen_flags: <defaults>
</compile_context>

<pallas_src>
import functools

import jax
import jax.numpy as jnp
from jax.experimental import pallas as pl
from jax.experimental.pallas import tpu as pltpu


# --------------------------------------------------------------------------
# LayerNorm kernel: one (block_rows, D) tile per grid step, normalize over D.
# --------------------------------------------------------------------------
def _layernorm_kernel(x_ref, g_ref, b_ref, o_ref, *, eps):
    x = x_ref[...].astype(jnp.float32)                       # (tm, D)
    mean = jnp.mean(x, axis=-1, keepdims=True)                # XLU reduce
    xc = x - mean
    var = jnp.mean(xc * xc, axis=-1, keepdims=True)           # XLU reduce
    inv = jax.lax.rsqrt(var + eps)                            # EUP
    o_ref[...] = (xc * inv * g_ref[...] + b_ref[...]).astype(o_ref.dtype)


def _pick_block_rows(M, D):
    """Largest row tile that (a) fits a conservative VMEM budget with
    double-buffered fp32 in+out tiles (safe on v7x's 32 MiB scoped VMEM) and
    (b) leaves >= 2 grid blocks when possible so both v7x TensorCores work."""
    bytes_per_row = 4 * D * 4              # fp32 in + out, double-buffered
    max_rows = max(8, (16 * 1024 * 1024) // bytes_per_row)
    cap = max(8, min(1024, (max_rows // 8) * 8))
    if M <= cap:
        # ~M/2 rounded up to a multiple of 8 -> 2 parallel blocks for megacore
        half = max(8, ((M + 15) // 16) * 8)
        return min(cap, half)
    return cap


def layer_norm_pallas(x, gamma, beta, *, eps=1e-5, block_rows=None):
    """LayerNorm over the last dim of x.  x: (..., D), gamma/beta: (D,)."""
    orig_shape = x.shape
    D = orig_shape[-1]
    assert D % 128 == 0, "feature dim must be a multiple of 128 (lane-dense)"

    M = 1
    for s in orig_shape[:-1]:
        M *= s
    x2 = x.reshape(M, D)

    if block_rows is None:
        block_rows = _pick_block_rows(M, D)
    block_rows = max(8, (block_rows // 8) * 8)

    # Pad the row count so every block is full (padded rows are discarded).
    Mp = ((M + block_rows - 1) // block_rows) * block_rows
    if Mp != M:
        x2 = jnp.pad(x2, ((0, Mp - M), (0, 0)))

    grid = (Mp // block_rows,)
    g2 = gamma.reshape(1, D).astype(jnp.float32)
    b2 = beta.reshape(1, D).astype(jnp.float32)

    bytes_accessed = (Mp * D * 2 + 2 * D) * 4
    cost = pl.CostEstimate(flops=8 * Mp * D, transcendentals=Mp,
                           bytes_accessed=bytes_accessed)

    out = pl.pallas_call(
        functools.partial(_layernorm_kernel, eps=eps),
        out_shape=jax.ShapeDtypeStruct((Mp, D), x.dtype),
        grid_spec=pltpu.PrefetchScalarGridSpec(
            num_scalar_prefetch=0,
            grid=grid,
            in_specs=[
                pl.BlockSpec((block_rows, D), lambda i: (i, 0)),
                # constant block index -> gamma/beta stay resident in VMEM
                pl.BlockSpec((1, D), lambda i: (0, 0)),
                pl.BlockSpec((1, D), lambda i: (0, 0)),
            ],
            out_specs=pl.BlockSpec((block_rows, D), lambda i: (i, 0)),
        ),
        compiler_params=pltpu.CompilerParams(
            dimension_semantics=("parallel",)),
        cost_estimate=cost,
    )(x2, g2, b2)

    if Mp != M:
        out = out[:M]
    return out.reshape(orig_shape)


# --------------------------------------------------------------------------
# CLIPTail forward: x -> final_layer_norm(x)
# --------------------------------------------------------------------------
def clip_tail_forward(params, x):
    return layer_norm_pallas(x, params["gamma"], params["beta"], eps=1e-5)


def _reference_layernorm(x, gamma, beta, eps=1e-5):
    mean = jnp.mean(x, axis=-1, keepdims=True)
    var = jnp.mean((x - mean) ** 2, axis=-1, keepdims=True)
    return (x - mean) * jax.lax.rsqrt(var + eps) * gamma + beta


if __name__ == "__main__":
    # CLIP text encoder hidden size is 768; small batch / sequence for testing.
    B, S, D = 2, 64, 768

    key = jax.random.PRNGKey(0)
    kx, kg, kb, kx2 = jax.random.split(key, 4)

    x = jax.random.normal(kx, (B, S, D), jnp.float32)
    params = {
        "gamma": 1.0 + 0.1 * jax.random.normal(kg, (D,), jnp.float32),
        "beta": 0.1 * jax.random.normal(kb, (D,), jnp.float32),
    }

    out = clip_tail_forward(params, x)
    jax.block_until_ready(out)

    ref = _reference_layernorm(x, params["gamma"], params["beta"])
    assert out.shape == x.shape
    assert jnp.allclose(out, ref, atol=1e-4, rtol=1e-4)

    # CLIP-like (non-multiple-of-8) row count to exercise the row-padding path
    # (B*S = 2*77 = 154 rows, CLIP's max text length is 77).
    x2 = jax.random.normal(kx2, (2, 77, D), jnp.float32)
    out2 = clip_tail_forward(params, x2)
    jax.block_until_ready(out2)
    ref2 = _reference_layernorm(x2, params["gamma"], params["beta"])
    assert out2.shape == x2.shape
    assert jnp.allclose(out2, ref2, atol=1e-4, rtol=1e-4)

    print("KERNEL_OK")
</pallas_src>

<mosaic_0001>
module attributes {stable_mosaic.version = 11 : i64} {
  func.func @_layernorm_kernel(%arg0: i32, %arg1: memref<64x768xf32, #tpu.memory_space<vmem>>, %arg2: memref<1x768xf32, #tpu.memory_space<vmem>>, %arg3: memref<1x768xf32, #tpu.memory_space<vmem>>, %arg4: memref<64x768xf32, #tpu.memory_space<vmem>>) attributes {dimension_semantics = [#tpu.dimension_semantics<parallel>], iteration_bounds = array<i64: 2>, scalar_prefetch = 0 : i64, scratch_operands = 0 : i64, tpu.core_type = #tpu.core_type<tc>, window_params = [{transform_indices = @transform_0, window_bounds = array<i64: 64, 768>}, {pipeline_mode = #tpu.pipeline_mode<synchronous>, transform_indices = @transform_1, window_bounds = array<i64: 1, 768>}, {pipeline_mode = #tpu.pipeline_mode<synchronous>, transform_indices = @transform_2, window_bounds = array<i64: 1, 768>}, {transform_indices = @transform_3, window_bounds = array<i64: 64, 768>}]} {
    %c0 = arith.constant 0 : index
    %c0_0 = arith.constant 0 : index
    %0 = vector.load %arg1[%c0, %c0_0] : memref<64x768xf32, #tpu.memory_space<vmem>>, vector<64x768xf32>
    %cst = arith.constant dense<0.000000e+00> : vector<64xf32>
    %1 = vector.multi_reduction <add>, %0, %cst [1] : vector<64x768xf32> to vector<64xf32>
    %2 = vector.shape_cast %1 : vector<64xf32> to vector<64x1xf32>
    %cst_1 = arith.constant 7.680000e+02 : f32
    %3 = vector.broadcast %cst_1 : f32 to vector<64x1xf32>
    %4 = arith.divf %2, %3 : vector<64x1xf32>
    %5 = vector.broadcast %4 : vector<64x1xf32> to vector<64x768xf32>
    %6 = arith.subf %0, %5 : vector<64x768xf32>
    %7 = arith.mulf %6, %6 : vector<64x768xf32>
    %cst_2 = arith.constant dense<0.000000e+00> : vector<64xf32>
    %8 = vector.multi_reduction <add>, %7, %cst_2 [1] : vector<64x768xf32> to vector<64xf32>
    %9 = vector.shape_cast %8 : vector<64xf32> to vector<64x1xf32>
    %cst_3 = arith.constant 7.680000e+02 : f32
    %10 = vector.broadcast %cst_3 : f32 to vector<64x1xf32>
    %11 = arith.divf %9, %10 : vector<64x1xf32>
    %cst_4 = arith.constant 9.99999974E-6 : f32
    %12 = vector.broadcast %cst_4 : f32 to vector<64x1xf32>
    %13 = arith.addf %11, %12 : vector<64x1xf32>
    %14 = math.rsqrt %13 : vector<64x1xf32>
    %15 = vector.broadcast %14 : vector<64x1xf32> to vector<64x768xf32>
    %16 = arith.mulf %6, %15 : vector<64x768xf32>
    %c0_5 = arith.constant 0 : index
    %c0_6 = arith.constant 0 : index
    %17 = vector.load %arg2[%c0_5, %c0_6] : memref<1x768xf32, #tpu.memory_space<vmem>>, vector<1x768xf32>
    %18 = vector.broadcast %17 : vector<1x768xf32> to vector<64x768xf32>
    %19 = arith.mulf %16, %18 : vector<64x768xf32>
    %c0_7 = arith.constant 0 : index
    %c0_8 = arith.constant 0 : index
    %20 = vector.load %arg3[%c0_7, %c0_8] : memref<1x768xf32, #tpu.memory_space<vmem>>, vector<1x768xf32>
    %21 = vector.broadcast %20 : vector<1x768xf32> to vector<64x768xf32>
    %22 = arith.addf %19, %21 : vector<64x768xf32>
    %c0_9 = arith.constant 0 : index
    %c0_10 = arith.constant 0 : index
    %23 = vector.load %arg4[%c0_9, %c0_10] : memref<64x768xf32, #tpu.memory_space<vmem>>, vector<64x768xf32>
    tpu.vector_store %arg4[%c0_9, %c0_10], %22 {strides = array<i32>} : memref<64x768xf32, #tpu.memory_space<vmem>>, vector<64x768xf32>,
    return
  }
  func.func @transform_0(%arg0: i32) -> (i32, i32) {
    %c0_i32 = arith.constant 0 : i32
    %c0_i32_0 = arith.constant 0 : i32
    return %arg0, %c0_i32 : i32, i32
  }
  func.func @transform_1(%arg0: i32) -> (i32, i32) {
    %c0_i32 = arith.constant 0 : i32
    %c0_i32_0 = arith.constant 0 : i32
    %c0_i32_1 = arith.constant 0 : i32
    return %c0_i32, %c0_i32_0 : i32, i32
  }
  func.func @transform_2(%arg0: i32) -> (i32, i32) {
    %c0_i32 = arith.constant 0 : i32
    %c0_i32_0 = arith.constant 0 : i32
    %c0_i32_1 = arith.constant 0 : i32
    return %c0_i32, %c0_i32_0 : i32, i32
  }
  func.func @transform_3(%arg0: i32) -> (i32, i32) {
    %c0_i32 = arith.constant 0 : i32
    %c0_i32_0 = arith.constant 0 : i32
    return %arg0, %c0_i32 : i32, i32
  }
}

</mosaic_0001>

<bundles_post_ra>
// kernel: tpu_custom_call.1
= control target key start
LH: loop header
LB: loop body
LE: loop exit
PB: predicated region body
PF: predicated region fallthrough
CT: control target
= control target key end

     0   :  { %8 = vsyncpa [#allocation3], 0  ;;  %s2116_s0 = inlined_call_operand.hbm [shape: f32[128,768], index: 0, kind: input, shape index: {}]   ;;  %s2117_s1 = inlined_call_operand.hbm [shape: f32[1,768], index: 1, kind: input, shape index: {}]   ;;  %s2118_s2 = inlined_call_operand.hbm [shape: f32[1,768], index: 2, kind: input, shape index: {}]   ;;  %s2119_s3 = inlined_call_operand.hbm [shape: f32[128,768], index: 3, kind: output, shape index: {}]  }
   0x1   :  { %10 = vsyncpa [#allocation3 + $0x1], 0 }
   0x2   :  { %11 = vsyncpa [#allocation6], 0 }
   0x3   :  { %12 = vsyncpa [#allocation4], 0 }
   0x4   :  { %14 = vsyncpa [#allocation4 + $0x1], 0  ;;  %s1218_s12 = smov 0   ;;  %s1220_s13 = smov 0  }
   0x5   :  { %s1222_s14 = smov 0   ;;  %s1224_s15 = smov 0  }
   0x6 LB: > { %s1239_s16 = sadd.s32 4294967295, %s1189_s15   ;;  %s919_s17 = sadd.s32 4294967294, %s1189_s15   ;;  %s1189_s15 = sphi %s1224_s15, %s2193_s15   ;;  %s1185_s14 = sphi %s1222_s14, %s2192_s14   ;;  %s1181_s13 = sphi %s1220_s13, %s2191_s13   ;;  %s1177_s12 = sphi %s1218_s12, %s2190_s12  }
   0x7   : > { %s1243_s18 = sadd.s32 1, %s1189_s15   ;;  %s27_s19 = sadd.s32 1, %s1185_s14 }
   0x8   : > { %s24_s20 = ssub.s32 %s1189_s15, %s1243_s18  ;;  %p34_p0 = scmp.ne.s32.totalorder %s1185_s14, %s1181_s13 }
   0x9   : > { %p25_p1 = scmp.eq.s32.totalorder %s24_s20, 0  ;;  %p35_p2 = scmp.eq.s32.totalorder %s1189_s15, 0 }
   0xa   : > { %p40_p3 = scmp.ne.s32.totalorder %s1181_s13, %s1177_s12  ;;  %p41_p4 = scmp.eq.s32.totalorder %s1239_s16, 0 }
   0xb   : > { %s1255_s21 = scalar_select %p25_p1, %s1185_s14, %s27_s19  }
   0xc   : > { %p1257_p5 = por %p35_p2, %p34_p0  ;;  %p1263_p6 = por %p41_p4, %p40_p3 }
   0xd   : > { %p106_p7 = scmp.eq.s32.totalorder %s1239_s16, 1  ;;  %p112_p8 = scmp.eq.s32.totalorder %s919_s17, 1 }
   0xe   : > { %p920_p9 = scmp.ge.s32.totalorder %s1189_s15, 1  ;;  %p119_p10 = scmp.lt.s32.totalorder %s1189_s15, 3 }
   0xf   : > { %p1270_p11 = por %p106_p7, %p34_p0  ;;  %p1274_p12 = por %p112_p8, %p40_p3 }
  0x10   : > { %p1278_p13 = pnand %p920_p9, %p119_p10  ;;  %s131_s29 = sshll.u32 %s2117_s1, 4  ;;  %s132_s29 = int_to_ptr.hbm [resolvable:$true] %s131_s29 }
  0x11   : > { %s1191_s30 = smov [#allocation5]   ;;  %p968_p3 = scmp.lt.s32.totalorder %s1189_s15, 2 }
  0x12   : > { %p951_p1 = pneg %p1278_p13  ;;  %s133_s4 = sshll.u32 %s1191_s30, 4  ;;  %s134_s4 = int_to_ptr.vmem [resolvable:$true] %s133_s4 }
  0x13   : > { %s143_s7 = sshll.u32 %s2118_s2, 4  ;;  %p1296_p7 = pnand %p968_p3, %p1257_p5  ;;  %s144_s7 = int_to_ptr.hbm [resolvable:$true] %s143_s7 }
  0x14   : > { %p952_p2 = pnand %p951_p1, %p41_p4  ;;  %s1192_s9 = smov [#allocation7]  }
  0x15   : > { %s145_s10 = sshll.u32 %s1192_s9, 4  ;;  %s156_s11 = sand.u32 1, %s1185_s14   ;;  %s146_s10 = int_to_ptr.vmem [resolvable:$true] %s145_s10 }
  0x16   : > { %954 = dma.hbm_to_vmem [thread:$0]  (!%p952_p2), %s132_s29, 96, %s134_s4, [#allocation6]  }
  0x17   : > { %957 = dma.hbm_to_vmem [thread:$0]  (!%p952_p2), %s144_s7, 96, %s146_s10, [#allocation6]  }
  0x18   : > { %s935_s17 = smul.u32 384, %s156_s11  ;;  %s157_s22 = scalar_lea.sflag [#allocation3], %s156_s11 }
  0x19   : > { %s936_s19 = smul.u32 384, %s1189_s15  ;;  %p1093_p8 = pneg %p1296_p7 }
  0x1a   : > { %s160_s30 = scalar_lea.vmem [#allocation2], %s935_s17  ;;  %s1096_s10 = scalar_lea.hbm %s2116_s0, 768 }
  0x1b   : > { %s166_s28 = scalar_lea.hbm %s2116_s0, %s936_s19  ;;  %s169_s5 = sshll.u32 %s160_s30, 4  ;;  %s170_s5 = int_to_ptr.vmem [resolvable:$true] %s169_s5 }
  0x1c   : > { %s167_s29 = sshll.u32 %s166_s28, 4  ;;  %s168_s29 = int_to_ptr.hbm [resolvable:$true] %s167_s29 }
  0x1d   : > { %s1089_s4 = sshra.s32 %s168_s29, 4  ;;  %s1090_s4 = int_to_ptr.hbm [resolvable:$true] %s1089_s4 }
  0x1e   : > { %s1091_s6 = scalar_lea.hbm %s1090_s4, 384  ;;  %p1097_p1 = scmp.lt.s32.totalorder %s1090_s4, %s2116_s0 }
  0x1f   : > { %p1092_p5 = scmp.ne.s32.totalorder %s1090_s4, %s1091_s6  ;;  %p1098_p2 = scmp.lt.s32.totalorder %s1096_s10, %s1091_s6 }
  0x21   : > { %p1094_p9 = pnand %p1093_p8, %p1092_p5  ;;  %p1099_p3 = por %p1098_p2, %p1097_p1 }
  0x23   : > { %p1095_p10 = pneg %p1094_p9 }
  0x25   : > { %p1100_p0 = pnand %p1099_p3, %p1095_p10 }
  0x27   : > { %1103 = shalt.err (!%p1100_p0)
}
  0x28   : > { %s1193_s11 = smov 768   ;;  %s1194_s17 = smov 48  }
  0x29   : > { %961 = dma.hbm_to_vmem [thread:$0]  (!%p1296_p7), %s168_s29, 6144, %s170_s5, %s157_s22, %s1193_s11, %s1193_s11, %s1194_s17  }
  0x2a   : > { %181 = sbr.rel (%p1278_p13) target bundleno = 405 (0x195), region = 32 }
  0x2f   : > { %s1318_s27 = sand.u32 1, %s1181_s13  }
  0x30   : > { %s937_s28 = smul.u32 384, %s1318_s27  ;;  %s184_s30 = scalar_lea.sflag [#allocation3], %s1318_s27 }
  0x32   : > { %s1324_s4 = scalar_lea.vmem [#allocation2], %s937_s28 }
  0x33   : > { %1164 = dma.done.wait (%p1263_p6), %s184_s30, 6144  }
  0x34   : > { %1166 = vsyncadd (%p1263_p6), %s184_s30, 4294961152 }
  0x35   : > { %1168 = dma.done.wait (%p41_p4), [#allocation6], 192  }
  0x36   : > { %1170 = vsyncadd (%p41_p4), [#allocation6], 4294967104  ;;  %v1335_v0 = vld [vmem:[%s1324_s4 + $0xc0] sm:$0xff]  ;;  %v1338_v1 = vld [vmem:[%s1324_s4 + $0xc8] sm:$0xff]  ;;  %s1859_s23 = scalar_lea.vmem [#allocation8], %s937_s28  ;;  %s938_s26 = smul.u32 384, %s1239_s16 }
  0x37   : > { %v1341_v2 = vld [vmem:[%s1324_s4 + $0xd0] sm:$0xff]  ;;  %v1344_v3 = vld [vmem:[%s1324_s4 + $0xd8] sm:$0xff]  ;;  %v299_v4 = vadd.f32 %v1338_v1, %v1335_v0  ;;  %v1349_v5 = vld [vmem:[%s1324_s4 + $0x60] sm:$0xff]  ;;  %s824_s29 = sshll.u32 %s1859_s23, 4  ;;  %s811_s6 = scalar_lea.sflag [#allocation4], %s1318_s27  ;;  %s825_s29 = int_to_ptr.vmem [resolvable:$true] %s824_s29 }
  0x38   : > { %v1352_v6 = vld [vmem:[%s1324_s4 + $0x68] sm:$0xff]  ;;  %v1355_v7 = vld [vmem:[%s1324_s4 + $0x70] sm:$0xff]  ;;  %v1358_v8 = vld [vmem:[%s1324_s4 + $0xe0] sm:$0xff]  ;;  %s823_s5 = scalar_lea.hbm %s2119_s3, %s938_s26  ;;  %s1139_s19 = scalar_lea.hbm %s2119_s3, 768 }
  0x39   : > { %v300_v9 = vadd.f32 %v299_v4, %v1341_v2  ;;  %v1362_v10 = vld [vmem:[%s1324_s4 + $0x78] sm:$0xff]  ;;  %v285_v11 = vadd.f32 %v1352_v6, %v1349_v5  ;;  %v1367_v12 = vld [vmem:[%s1324_s4] sm:$0xff]  ;;  %v1370_v13 = vld [vmem:[%s1324_s4 + $0x8] sm:$0xff]  ;;  %s826_s22 = sshll.u32 %s823_s5, 4  ;;  %s827_s22 = int_to_ptr.hbm [resolvable:$true] %s826_s22 }
  0x3a   : > { %v1373_v14 = vld [vmem:[%s1324_s4 + $0x10] sm:$0xff]  ;;  %v1376_v15 = vld [vmem:[%s1324_s4 + $0xe8] sm:$0xff]  ;;  %v1380_v17 = vld [vmem:[%s1324_s4 + $0x80] sm:$0xff]  ;;  %v271_v20 = vadd.f32 %v1370_v13, %v1367_v12  ;;  %s1133_s7 = sshra.s32 %s827_s22, 4  ;;  %s1134_s7 = int_to_ptr.hbm [resolvable:$true] %s1133_s7 }
  0x3b   : > { %v301_v16 = vadd.f32 %v300_v9, %v1344_v3  ;;  %v286_v18 = vadd.f32 %v285_v11, %v1355_v7  ;;  %v1384_v19 = vld [vmem:[%s1324_s4 + $0x18] sm:$0xff]  ;;  %v1389_v21 = vld [vmem:[%s1324_s4 + $0xf0] sm:$0xff]  ;;  %v1395_v23 = vld [vmem:[%s1324_s4 + $0x100] sm:$0xff]  ;;  %s1135_s9 = scalar_lea.hbm %s1134_s7, 384  ;;  %p1140_p0 = scmp.lt.s32.totalorder %s1134_s7, %s2119_s3 }
  0x3c   : > { %v1392_v22 = vld [vmem:[%s1324_s4 + $0xf8] sm:$0xff]  ;;  %v1399_v25 = vld [vmem:[%s1324_s4 + $0x88] sm:$0xff]  ;;  %v1403_v27 = vld [vmem:[%s1324_s4 + $0x20] sm:$0xff]  ;;  %v272_v28 = vadd.f32 %v271_v20, %v1373_v14  ;;  %p1136_p4 = scmp.ne.s32.totalorder %s1134_s7, %s1135_s9  ;;  %p1141_p7 = scmp.lt.s32.totalorder %s1139_s19, %s1135_s9 }
  0x3d   : > { %v302_v24 = vadd.f32 %v301_v16, %v1358_v8  ;;  %v287_v26 = vadd.f32 %v286_v18, %v1362_v10  ;;  %v306_v29 = vadd.f32 %v1392_v22, %v1389_v21  ;;  %v1409_v30 = vld [vmem:[%s1324_s4 + $0x108] sm:$0xff]  ;;  %v1412_v31 = vld [vmem:[%s1324_s4 + $0x90] sm:$0xff]  ;;  %v1415_v32 = vld [vmem:[%s1324_s4 + $0x98] sm:$0xff] }
  0x3e   : > { %v1420_v35 = vld [vmem:[%s1324_s4 + $0x28] sm:$0xff]  ;;  %v273_v36 = vadd.f32 %v272_v28, %v1384_v19  ;;  %v1424_v37 = vld [vmem:[%s1324_s4 + $0x110] sm:$0xff]  ;;  %v1428_v39 = vld [vmem:[%s1324_s4 + $0xa0] sm:$0xff]  ;;  %v292_v40 = vadd.f32 %v1415_v32, %v1412_v31  ;;  %p1137_p6 = pnand %p1136_p4, %p1270_p11  ;;  %p1142_p5 = por %p1141_p7, %p1140_p0 }
  0x3f   : > { %v303_v33 = vadd.f32 %v302_v24, %v1376_v15  ;;  %v288_v34 = vadd.f32 %v287_v26, %v1380_v17  ;;  %v307_v38 = vadd.f32 %v306_v29, %v1395_v23  ;;  %v1433_v41 = vld [vmem:[%s1324_s4 + $0x30] sm:$0xff]  ;;  %v1436_v42 = vld [vmem:[%s1324_s4 + $0x38] sm:$0xff]  ;;  %v1439_v43 = vld [vmem:[%s1324_s4 + $0x40] sm:$0xff] }
  0x40   : > { %v274_v45 = vadd.f32 %v273_v36, %v1403_v27  ;;  %v1444_v46 = vld [vmem:[%s1324_s4 + $0x118] sm:$0xff]  ;;  %v1448_v48 = vld [vmem:[%s1324_s4 + $0xa8] sm:$0xff]  ;;  %v278_v50 = vadd.f32 %v1436_v42, %v1433_v41  ;;  %v293_v51 = vadd.f32 %v292_v40, %v1428_v39  ;;  %v1457_v52 = vld [vmem:[%s1324_s4 + $0x150] sm:$0xff]  ;;  %p1138_p13 = pneg %p1137_p6 }
  0x41   : > { %304 = vadd.xlane.f32.xlu2 %v303_v33  ;;  %v289_v44 = vadd.f32 %v288_v34, %v1399_v25  ;;  %v308_v47 = vadd.f32 %v307_v38, %v1409_v30  ;;  %v1451_v49 = vld [vmem:[%s1324_s4 + $0x48] sm:$0xff]  ;;  %v1460_v53 = vld [vmem:[%s1324_s4 + $0x158] sm:$0xff]  ;;  %v1463_v54 = vld [vmem:[%s1324_s4 + $0x160] sm:$0xff] }
  0x42   : > { %v275_v55 = vadd.f32 %v274_v45, %v1420_v35  ;;  %v1468_v57 = vld [vmem:[%s1324_s4 + $0xb0] sm:$0xff]  ;;  %v279_v59 = vadd.f32 %v278_v50, %v1439_v43  ;;  %v1475_v60 = vld [vmem:[%s1324_s4 + $0x168] sm:$0xff]  ;;  %v320_v61 = vadd.f32 %v1460_v53, %v1457_v52  ;;  %v294_v62 = vadd.f32 %v293_v51, %v1448_v48  ;;  %v1481_v63 = vld [vmem:[%s1324_s4 + $0x120] sm:$0xff]  ;;  %p1143_p8 = pnand %p1142_p5, %p1138_p13 }
  0x43   : > { %290 = vadd.xlane.f32.xlu1 %v289_v44  ;;  %v309_v56 = vadd.f32 %v308_v47, %v1424_v37  ;;  %v1471_v58 = vld [vmem:[%s1324_s4 + $0x50] sm:$0xff]  ;;  %v1484_v4 = vld [vmem:[%s1324_s4 + $0x128] sm:$0xff]  ;;  %v1491_v16 = vld [vmem:[%s1324_s4 + $0xb8] sm:$0xff] }
  0x44   : > { %v1487_v9 = vld [vmem:[%s1324_s4 + $0x130] sm:$0xff]  ;;  %276 = vadd.xlane.f32.xlu0 %v275_v55  ;;  %v280_v18 = vadd.f32 %v279_v59, %v1451_v49  ;;  %v321_v20 = vadd.f32 %v320_v61, %v1463_v54  ;;  %v313_v24 = vadd.f32 %v1484_v4, %v1481_v63  ;;  %v295_v26 = vadd.f32 %v294_v62, %v1468_v57  ;;  %v1499_v28 = vld [vmem:[%s1324_s4 + $0x58] sm:$0xff]  ;;  %v1514_v47 = vld [vmem:[%s1324_s4 + $0x140] sm:$0xff] }
  0x45   : > { %v310_v11 = vadd.f32 %v309_v56, %v1444_v46  ;;  %v1502_v29 = vld [vmem:[%s1324_s4 + $0x138] sm:$0xff]  ;;  %v1509_v40 = vld [vmem:[%s1324_s4 + $0x170] sm:$0xff]  ;;  %v1522_v56 = vld [vmem:[%s1324_s4 + $0x148] sm:$0xff]  ;;  %v1195_v62 = vmov 768.0  }
  0x46   : > { %v281_v33 = vadd.f32 %v280_v18, %v1471_v58  ;;  %v322_v34 = vadd.f32 %v321_v20, %v1475_v60  ;;  %v314_v36 = vadd.f32 %v313_v24, %v1487_v9  ;;  %v296_v38 = vadd.f32 %v295_v26, %v1491_v16  ;;  %v1518_v51 = vld [vmem:[%s1324_s4 + $0x178] sm:$0xff] }
  0x47   : > { %1011 = vrcp.f32 %v1195_v62 }
  0x48   : > { %v282_v44 = vadd.f32 %v281_v33, %v1499_v28  ;;  %v315_v45 = vadd.f32 %v314_v36, %v1502_v29  ;;  %v323_v50 = vadd.f32 %v322_v34, %v1509_v40 }
  0x49   : > { %311 = vadd.xlane.f32.xlu2 %v310_v11 }
  0x4a   : > { %v316_v55 = vadd.f32 %v315_v45, %v1514_v47  ;;  %v324_v59 = vadd.f32 %v323_v50, %v1518_v51 }
  0x4b   : > { %297 = vadd.xlane.f32.xlu1 %v296_v38 }
  0x4c   : > { %283 = vadd.xlane.f32.xlu0 %v282_v44  ;;  %v317_v61 = vadd.f32 %v316_v55, %v1522_v56 }
  0x4d   : > { %v1012_v11 = vpop.eup %1011 }
  0x4e   : > { %v328_v18 = vmul.f32 768.0, %v1012_v11  ;;  %vm332_vm0 = vweird.f32 %v1012_v11 }
  0x50   : > { %v329_v20 = vsub.f32 1.0, %v328_v18 }
  0x52   : > { %v330_v24 = vmul.f32 %v1012_v11, %v329_v20 }
  0x53   : > { %325 = vadd.xlane.f32.xlu1 %v324_v59 }
  0x54   : > { %318 = vadd.xlane.f32.xlu0 %v317_v61  ;;  %v331_v26 = vadd.f32 %v1012_v11, %v330_v24 }
  0x56   : > { %v1526_v33 = vsel %vm332_vm0, %v1012_v11, %v331_v26 }
  0xb4   : > { %v305_v34 = vpop.xlane.xlu2 %304 }
  0xb5   : > { %v1529_v36 = vmul.f32 %v1526_v33, %v305_v34 }
  0xb6   : > { %v291_v38 = vpop.xlane.xlu1 %290 }
  0xb7   : > { %v336_v44 = vmul.f32 %v1526_v33, %v291_v38  ;;  %v277_v45 = vpop.xlane.xlu0 %276  ;;  %v1534_v50 = vsub.f32 %v1335_v0, %v1529_v36  ;;  %v1557_v20 = vsub.f32 %v1338_v1, %v1529_v36  ;;  %v1575_v1 = vsub.f32 %v1341_v2, %v1529_v36 }
  0xb8   : > { %v334_v55 = vmul.f32 %v1526_v33, %v277_v45  ;;  %v1579_v26 = vsub.f32 %v1344_v3, %v1529_v36 }
  0xb9   : > { %2147 = vst [vmem:[#allocation12_spill] sm:$0xff] %v1534_v50  ;;  %v1538_v59 = vsub.f32 %v1349_v5, %v336_v44  ;;  %v1541_v61 = vsub.f32 %v1352_v6, %v336_v44  ;;  %v1544_v62 = vsub.f32 %v1355_v7, %v336_v44  ;;  %v1547_v11 = vsub.f32 %v1362_v10, %v336_v44 }
  0xba   : > { %v1550_v18 = vsub.f32 %v1380_v17, %v336_v44  ;;  %v1553_v0 = vsub.f32 %v1399_v25, %v336_v44  ;;  %2152 = vst [vmem:[#allocation17_spill] sm:$0xff] %v1557_v20  ;;  %v1566_v10 = vsub.f32 %v1367_v12, %v334_v55  ;;  %v1571_v24 = vsub.f32 %v1370_v13, %v334_v55 }
  0xbb   : > { %2148 = vst [vmem:[#allocation13_spill] sm:$0xff] %v1544_v62  ;;  %v402_v5 = vmul.f32 %v1538_v59, %v1538_v59  ;;  %v403_v6 = vmul.f32 %v1541_v61, %v1541_v61  ;;  %v404_v7 = vmul.f32 %v1544_v62, %v1544_v62  ;;  %v405_v25 = vmul.f32 %v1547_v11, %v1547_v11 }
  0xbc   : > { %2149 = vst [vmem:[#allocation14_spill] sm:$0xff] %v1547_v11  ;;  %v312_v17 = vpop.xlane.xlu2 %311  ;;  %v1583_v12 = vsub.f32 %v1373_v14, %v334_v55  ;;  %v1586_v44 = vsub.f32 %v1384_v19, %v334_v55  ;;  %v1589_v13 = vsub.f32 %v1403_v27, %v334_v55  ;;  %v390_v2 = vmul.f32 %v1566_v10, %v1566_v10 }
  0xbd   : > { %2150 = vst [vmem:[#allocation15_spill] sm:$0xff] %v1550_v18  ;;  %v339_v34 = vmul.f32 %v1526_v33, %v312_v17  ;;  %v452_v38 = vadd.f32 %v403_v6, %v402_v5  ;;  %v391_v3 = vmul.f32 %v1571_v24, %v1571_v24  ;;  %v1597_v17 = vsub.f32 %v1358_v8, %v1529_v36 }
  0xbe   : > { %2151 = vst [vmem:[#allocation16_spill] sm:$0xff] %v1553_v0  ;;  %v298_v45 = vpop.xlane.xlu1 %297  ;;  %v406_v14 = vmul.f32 %v1550_v18, %v1550_v18  ;;  %v407_v19 = vmul.f32 %v1553_v0, %v1553_v0  ;;  %v1604_v27 = vsub.f32 %v1420_v35, %v334_v55  ;;  %v393_v18 = vmul.f32 %v1586_v44, %v1586_v44 }
  0xbf   : > { %2153 = vst [vmem:[#allocation18_spill] sm:$0xff] %v1566_v10  ;;  %v453_v5 = vadd.f32 %v452_v38, %v404_v7  ;;  %v337_v6 = vmul.f32 %v1526_v33, %v298_v45  ;;  %v284_v10 = vpop.xlane.xlu0 %283  ;;  %v438_v11 = vadd.f32 %v391_v3, %v390_v2  ;;  %v1610_v8 = vsub.f32 %v1389_v21, %v339_v34 }
  0xc0   : > { %2154 = vst [vmem:[#allocation19_spill] sm:$0xff] %v1571_v24  ;;  %v392_v24 = vmul.f32 %v1583_v12, %v1583_v12  ;;  %v1615_v0 = vsub.f32 %v1392_v22, %v339_v34  ;;  %v1618_v35 = vsub.f32 %v1395_v23, %v339_v34  ;;  %v394_v55 = vmul.f32 %v1589_v13, %v1589_v13 }
  0xc1   : > { %2155 = vst [vmem:[#allocation20_spill] sm:$0xff] %v1575_v1  ;;  %v454_v62 = vadd.f32 %v453_v5, %v405_v25  ;;  %v1623_v38 = vsub.f32 %v1409_v30, %v339_v34  ;;  %v1626_v21 = vsub.f32 %v1424_v37, %v339_v34  ;;  %v420_v45 = vmul.f32 %v1610_v8, %v1610_v8 }
  0xc2   : > { %2156 = vst [vmem:[#allocation21_spill] sm:$0xff] %v1579_v26  ;;  %v439_v7 = vadd.f32 %v438_v11, %v392_v24  ;;  %v421_v22 = vmul.f32 %v1615_v0, %v1615_v0  ;;  %v422_v23 = vmul.f32 %v1618_v35, %v1618_v35  ;;  %v395_v2 = vmul.f32 %v1604_v27, %v1604_v27 }
  0xc3   : > { %2157 = vst [vmem:[#allocation22_spill] sm:$0xff] %v1597_v17  ;;  %v455_v25 = vadd.f32 %v454_v62, %v406_v14  ;;  %v1637_v30 = vsub.f32 %v1444_v46, %v339_v34  ;;  %v423_v37 = vmul.f32 %v1623_v38, %v1623_v38  ;;  %v1642_v3 = vsub.f32 %v1412_v31, %v337_v6 }
  0xc4   : > { %2158 = vst [vmem:[#allocation23_spill] sm:$0xff] %v1615_v0  ;;  %v440_v11 = vadd.f32 %v439_v7, %v393_v18  ;;  %v473_v24 = vadd.f32 %v421_v22, %v420_v45  ;;  %v1645_v14 = vsub.f32 %v1415_v32, %v337_v6  ;;  %v335_v5 = vmul.f32 %v1526_v33, %v284_v10 }
  0xc5   : > { %2159 = vst [vmem:[#allocation24_spill] sm:$0xff] %v1618_v35  ;;  %v456_v62 = vadd.f32 %v455_v25, %v407_v19  ;;  %v1649_v0 = vsub.f32 %v1428_v39, %v337_v6  ;;  %v1652_v46 = vsub.f32 %v1448_v48, %v337_v6  ;;  %v424_v18 = vmul.f32 %v1626_v21, %v1626_v21 }
  0xc6   : > { %v441_v35 = vadd.f32 %v440_v11, %v394_v55  ;;  %v474_v34 = vadd.f32 %v473_v24, %v422_v23  ;;  %v408_v31 = vmul.f32 %v1642_v3, %v1642_v3  ;;  %v414_v32 = vmul.f32 %v1534_v50, %v1534_v50 }
  0xc7   : > { %457 = vadd.xlane.f32.xlu1 %v456_v62  ;;  %v319_v19 = vpop.xlane.xlu0 %318  ;;  %v1661_v55 = vsub.f32 %v1468_v57, %v337_v6  ;;  %v409_v39 = vmul.f32 %v1645_v14, %v1645_v14  ;;  %v410_v48 = vmul.f32 %v1649_v0, %v1649_v0  ;;  %v425_v7 = vmul.f32 %v1637_v30, %v1637_v30 }
  0xc8   : > { %v442_v10 = vadd.f32 %v441_v35, %v395_v2  ;;  %v475_v25 = vadd.f32 %v474_v34, %v423_v37  ;;  %v1670_v45 = vsub.f32 %v1491_v16, %v337_v6  ;;  %v411_v22 = vmul.f32 %v1652_v46, %v1652_v46  ;;  %v326_v35 = vpop.xlane.xlu1 %325 }
  0xc9   : > { %v459_v57 = vadd.f32 %v409_v39, %v408_v31  ;;  %v1675_v23 = vsub.f32 %v1433_v41, %v335_v5  ;;  %v1678_v2 = vsub.f32 %v1436_v42, %v335_v5  ;;  %v1681_v11 = vsub.f32 %v1439_v43, %v335_v5 }
  0xca   : > { %443 = vadd.xlane.f32.xlu2 %v442_v10  ;;  %v340_v37 = vmul.f32 %v1526_v33, %v319_v19  ;;  %v476_v62 = vadd.f32 %v475_v25, %v424_v18  ;;  %v1685_v16 = vsub.f32 %v1451_v49, %v335_v5  ;;  %v1688_v6 = vsub.f32 %v1471_v58, %v335_v5 }
  0xcb   : > { %v412_v24 = vmul.f32 %v1661_v55, %v1661_v55  ;;  %v460_v41 = vadd.f32 %v459_v57, %v410_v48  ;;  %v396_v42 = vmul.f32 %v1675_v23, %v1675_v23  ;;  %v397_v43 = vmul.f32 %v1678_v2, %v1678_v2 }
  0xcc   : > { %v341_v34 = vmul.f32 %v1526_v33, %v326_v35  ;;  %v477_v31 = vadd.f32 %v476_v62, %v425_v7  ;;  %v413_v49 = vmul.f32 %v1670_v45, %v1670_v45  ;;  %v398_v58 = vmul.f32 %v1681_v11, %v1681_v11 }
  0xcd   : > { %v461_v18 = vadd.f32 %v460_v41, %v411_v22  ;;  %v445_v19 = vadd.f32 %v397_v43, %v396_v42  ;;  %v415_v10 = vmul.f32 %v1557_v20, %v1557_v20  ;;  %v416_v39 = vmul.f32 %v1575_v1, %v1575_v1  ;;  %v2171_v1 = vld [vmem:[#allocation16_spill] sm:$0xff] }
  0xce   : > { %v1706_v48 = vsub.f32 %v1499_v28, %v335_v5  ;;  %v399_v7 = vmul.f32 %v1685_v16, %v1685_v16  ;;  %v400_v25 = vmul.f32 %v1688_v6, %v1688_v6  ;;  %v1713_v35 = vsub.f32 %v1481_v63, %v340_v37 }
  0xcf   : > { %478 = vadd.xlane.f32.xlu1 %v477_v31  ;;  %v462_v22 = vadd.f32 %v461_v18, %v412_v24  ;;  %v446_v57 = vadd.f32 %v445_v19, %v398_v58  ;;  %v466_v62 = vadd.f32 %v415_v10, %v414_v32  ;;  %v1716_v41 = vsub.f32 %v1484_v4, %v340_v37 }
  0xd0   : > { %v417_v42 = vmul.f32 %v1579_v26, %v1579_v26  ;;  %v1721_v28 = vsub.f32 %v1487_v9, %v340_v37  ;;  %v1724_v5 = vsub.f32 %v1502_v29, %v340_v37  ;;  %v1727_v43 = vsub.f32 %v1514_v47, %v340_v37 }
  0xd1   : > { %v463_v63 = vadd.f32 %v462_v22, %v413_v49  ;;  %v447_v31 = vadd.f32 %v446_v57, %v399_v7  ;;  %v467_v24 = vadd.f32 %v466_v62, %v416_v39  ;;  %v426_v32 = vmul.f32 %v1713_v35, %v1713_v35 }
  0xd2   : > { %v401_v4 = vmul.f32 %v1706_v48, %v1706_v48  ;;  %v1735_v58 = vsub.f32 %v1376_v15, %v1529_v36  ;;  %v427_v9 = vmul.f32 %v1716_v41, %v1716_v41  ;;  %v428_v29 = vmul.f32 %v1721_v28, %v1721_v28 }
  0xd3   : > { %464 = vadd.xlane.f32.xlu2 %v463_v63  ;;  %v448_v47 = vadd.f32 %v447_v31, %v400_v25  ;;  %v418_v49 = vmul.f32 %v1597_v17, %v1597_v17  ;;  %v1744_v18 = vsub.f32 %v1522_v56, %v340_v37  ;;  %v1747_v19 = vsub.f32 %v1457_v52, %v341_v34  ;;  %v2170_v17 = vld [vmem:[#allocation15_spill] sm:$0xff] }
  0xd4   : > { %2160 = vst [vmem:[#allocation25_spill] sm:$0xff] %v1735_v58  ;;  %v429_v15 = vmul.f32 %v1724_v5, %v1724_v5  ;;  %v480_v36 = vadd.f32 %v427_v9, %v426_v32  ;;  %v1752_v10 = vsub.f32 %v1460_v53, %v341_v34  ;;  %v1755_v39 = vsub.f32 %v1463_v54, %v341_v34 }
  0xd5   : > { %2161 = vst [vmem:[#allocation26_spill] sm:$0xff] %v1744_v18  ;;  %v449_v7 = vadd.f32 %v448_v47, %v401_v4  ;;  %v468_v25 = vadd.f32 %v467_v24, %v417_v42  ;;  %v430_v22 = vmul.f32 %v1727_v43, %v1727_v43  ;;  %v1760_v56 = vsub.f32 %v1475_v60, %v341_v34 }
  0xd6   : > { %2162 = vst [vmem:[#allocation27_spill] sm:$0xff] %v1747_v19  ;;  %v481_v52 = vadd.f32 %v480_v36, %v428_v29  ;;  %v432_v37 = vmul.f32 %v1747_v19, %v1747_v19  ;;  %v433_v57 = vmul.f32 %v1752_v10, %v1752_v10  ;;  %v434_v53 = vmul.f32 %v1755_v39, %v1755_v39 }
  0xd7   : > { %2163 = vst [vmem:[#allocation28_spill] sm:$0xff] %v1752_v10  ;;  %450 = vadd.xlane.f32.xlu0 %v449_v7  ;;  %v431_v54 = vmul.f32 %v1744_v18, %v1744_v18  ;;  %v419_v60 = vmul.f32 %v1735_v58, %v1735_v58  ;;  %v469_v63 = vadd.f32 %v468_v25, %v418_v49  ;;  %v2169_v58 = vld [vmem:[#allocation14_spill] sm:$0xff] }
  0xd8   : > { %2164 = vst [vmem:[#allocation29_spill] sm:$0xff] %v1755_v39  ;;  %v482_v62 = vadd.f32 %v481_v52, %v429_v15  ;;  %v487_v42 = vadd.f32 %v433_v57, %v432_v37  ;;  %v1773_v31 = vsub.f32 %v1509_v40, %v341_v34  ;;  %v435_v24 = vmul.f32 %v1760_v56, %v1760_v56 }
  0xd9   : > { %2165 = vst [vmem:[#allocation30_spill] sm:$0xff] %v1760_v56  ;;  %v470_v29 = vadd.f32 %v469_v63, %v419_v60  ;;  %v1778_v47 = vsub.f32 %v1518_v51, %v341_v34  ;;  %v700_v63 = vld [vmem:[#allocation7] sm:$0x3f] }
  0xda   : > { %2166 = vst [vmem:[#allocation31_spill] sm:$0xff] %v1773_v31  ;;  %v483_v32 = vadd.f32 %v482_v62, %v430_v22  ;;  %v488_v4 = vadd.f32 %v487_v42, %v434_v53  ;;  %v436_v15 = vmul.f32 %v1773_v31, %v1773_v31  ;;  %v638_v62 = vld [vmem:[#allocation5] sm:$0x3f]  ;;  %v1818_v10 = vperm.slane %v700_v63, 5 }
  0xdb   : > { %2167 = vst [vmem:[#allocation32_spill] sm:$0xff] %v1778_v47  ;;  %v437_v40 = vmul.f32 %v1778_v47, %v1778_v47  ;;  %v1811_v47 = vperm.slane %v700_v63, 3 }
  0xdc   : > { %v484_v9 = vadd.f32 %v483_v32, %v431_v54  ;;  %v489_v36 = vadd.f32 %v488_v4, %v435_v24  ;;  %v1790_v4 = vperm.slane %v638_v62, 0 }
  0xde   : > { %485 = vadd.xlane.f32.xlu2 %v484_v9  ;;  %v490_v49 = vadd.f32 %v489_v36, %v436_v15  ;;  %v1793_v15 = vperm.slane %v638_v62, 1  ;;  %v1795_v36 = vperm.slane %v638_v62, 2 }
  0xdf   : > { %471 = vadd.xlane.f32.xlu0 %v470_v29 }
  0xe0   : > { %v491_v7 = vadd.f32 %v490_v49, %v437_v40  ;;  %v1797_v40 = vperm.slane %v638_v62, 3 }
  0xe7   : > { %492 = vadd.xlane.f32.xlu0 %v491_v7  ;;  %v1799_v7 = vperm.slane %v638_v62, 4 }
 0x13a   : > { %v458_v25 = vpop.xlane.xlu1 %457 }
 0x13b   : > { %v496_v22 = vmul.f32 %v458_v25, %v1526_v33  ;;  %v1801_v25 = vperm.slane %v638_v62, 5  ;;  %v1816_v62 = vperm.slane %v700_v63, 4 }
 0x13d   : > { %v504_v52 = vadd.f32 1e-05, %v496_v22  ;;  %v444_v37 = vpop.xlane.xlu2 %443  ;;  %v1803_v22 = vperm.slane %v700_v63, 0 }
 0x13e   : > { %v494_v51 = vmul.f32 %v444_v37, %v1526_v33 }
 0x13f   : > { %1013 = vrsqrt.f32 %v504_v52  ;;  %vm536_vm2 = vweird.f32 %v504_v52 }
 0x140   : > { %v502_v34 = vadd.f32 1e-05, %v494_v51  ;;  %v1805_v51 = vperm.slane %v700_v63, 1 }
 0x142   : > { %1015 = vrsqrt.f32 %v502_v34  ;;  %v479_v57 = vpop.xlane.xlu1 %478  ;;  %vm516_vm3 = vweird.f32 %v502_v34 }
 0x143   : > { %v499_v53 = vmul.f32 %v479_v57, %v1526_v33  ;;  %v1807_v57 = vperm.slane %v700_v63, 2 }
 0x145   : > { %v1014_v54 = vpop.eup %1013  ;;  %v1787_v42 = vadd.f32 1e-05, %v499_v53 }
 0x146   : > { %v531_v60 = vmul.f32 %v1014_v54, %v504_v52  ;;  %v465_v24 = vpop.xlane.xlu2 %464  ;;  %vm537_vm1 = vweird.f32 %v1014_v54 }
 0x147   : > { %1017 = vrsqrt.f32 %v1787_v42  ;;  %v497_v29 = vmul.f32 %v465_v24, %v1526_v33  ;;  %vm538_vm4 = vmor %vm536_vm2, %vm537_vm1  ;;  %vm566_vm6 = vweird.f32 %v1787_v42 }
 0x148   : > { %v1016_v32 = vpop.eup %1015  ;;  %v532_v9 = vmul.f32 %v1014_v54, %v531_v60 }
 0x149   : > { %v511_v49 = vmul.f32 %v1016_v32, %v502_v34  ;;  %v1809_v60 = vadd.f32 1e-05, %v497_v29  ;;  %vm517_vm5 = vweird.f32 %v1016_v32 }
 0x14a   : > { %v533_v37 = vmul.f32 0.5, %v532_v9  ;;  %v451_v24 = vpop.xlane.xlu0 %450  ;;  %vm518_vm8 = vmor %vm516_vm3, %vm517_vm5 }
 0x14b   : > { %v512_v53 = vmul.f32 %v1016_v32, %v511_v49  ;;  %v495_v56 = vmul.f32 %v451_v24, %v1526_v33  ;;  %1019 = vrsqrt.f32 %v1809_v60  ;;  %vm546_vm11 = vweird.f32 %v1809_v60 }
 0x14c   : > { %v534_v31 = vsub.f32 1.5, %v533_v37 }
 0x14d   : > { %v1814_v39 = vpop.eup %1017  ;;  %v513_v9 = vmul.f32 0.5, %v512_v53  ;;  %v1822_v49 = vadd.f32 1e-05, %v495_v56  ;;  %v2168_v56 = vld [vmem:[#allocation13_spill] sm:$0xff] }
 0x14e   : > { %v535_v19 = vmul.f32 %v1014_v54, %v534_v31  ;;  %v561_v29 = vmul.f32 %v1814_v39, %v1787_v42  ;;  %vm567_vm7 = vweird.f32 %v1814_v39 }
 0x14f   : > { %v514_v37 = vsub.f32 1.5, %v513_v9  ;;  %1021 = vrsqrt.f32 %v1822_v49  ;;  %vm568_vm9 = vmor %vm566_vm6, %vm567_vm7  ;;  %vm526_vm12 = vweird.f32 %v1822_v49 }
 0x150   : > { %v539_v24 = vsel %vm538_vm4, %v1014_v54, %v535_v19  ;;  %v562_v63 = vmul.f32 %v1814_v39, %v561_v29 }
 0x151   : > { %v602_v31 = vmul.f32 %v539_v24, %v1538_v59  ;;  %v603_v52 = vmul.f32 %v539_v24, %v1541_v61  ;;  %v604_v53 = vmul.f32 %v539_v24, %v2168_v56  ;;  %v605_v9 = vmul.f32 %v539_v24, %v2169_v58 }
 0x152   : > { %v606_v26 = vmul.f32 %v539_v24, %v2170_v17  ;;  %v607_v20 = vmul.f32 %v539_v24, %v2171_v1  ;;  %v515_v50 = vmul.f32 %v1016_v32, %v514_v37  ;;  %v563_v19 = vmul.f32 0.5, %v562_v63  ;;  %v1843_v37 = vpop.eup %1019 }
 0x153   : > { %v664_v54 = vmul.f32 %v1790_v4, %v602_v31  ;;  %v665_v29 = vmul.f32 %v1793_v15, %v603_v52  ;;  %v666_v18 = vmul.f32 %v1795_v36, %v604_v53  ;;  %v667_v59 = vmul.f32 %v1797_v40, %v605_v9  ;;  %v2172_v53 = vld [vmem:[#allocation18_spill] sm:$0xff]  ;;  %v1855_v9 = vpop.xlane.xlu0 %471 }
 0x154   : > { %v668_v61 = vmul.f32 %v1799_v7, %v606_v26  ;;  %v669_v17 = vmul.f32 %v1801_v25, %v607_v20  ;;  %v519_v58 = vsel %vm518_vm8, %v1016_v32, %v515_v50  ;;  %v564_v1 = vsub.f32 1.5, %v563_v19  ;;  %v2173_v50 = vld [vmem:[#allocation19_spill] sm:$0xff] }
 0x155   : > { %v726_v24 = vadd.f32 %v1803_v22, %v664_v54  ;;  %v727_v63 = vadd.f32 %v1805_v51, %v665_v29  ;;  %v728_v31 = vadd.f32 %v1807_v57, %v666_v18  ;;  %v729_v52 = vadd.f32 %v1811_v47, %v667_v59  ;;  %v1849_v56 = vpop.eup %1021 }
 0x156   : > { %v730_v34 = vadd.f32 %v1816_v62, %v668_v61  ;;  %v731_v26 = vadd.f32 %v1818_v10, %v669_v17  ;;  %v590_v20 = vmul.f32 %v519_v58, %v2172_v53  ;;  %v591_v32 = vmul.f32 %v519_v58, %v2173_v50 }
 0x157   : > { %774 = vst [vmem:[%s1859_s23 + $0x60] sm:$0xff] %v726_v24  ;;  %v592_v18 = vmul.f32 %v519_v58, %v1583_v12  ;;  %v593_v19 = vmul.f32 %v519_v58, %v1586_v44  ;;  %v594_v54 = vmul.f32 %v519_v58, %v1589_v13  ;;  %v595_v29 = vmul.f32 %v519_v58, %v1604_v27 }
 0x158   : > { %775 = vst [vmem:[%s1859_s23 + $0x68] sm:$0xff] %v727_v63  ;;  %v652_v59 = vmul.f32 %v1790_v4, %v590_v20  ;;  %v653_v61 = vmul.f32 %v1793_v15, %v591_v32  ;;  %v565_v17 = vmul.f32 %v1814_v39, %v564_v1  ;;  %v541_v24 = vmul.f32 %v1843_v37, %v1809_v60  ;;  %v2174_v32 = vld [vmem:[#allocation23_spill] sm:$0xff] }
 0x159   : > { %776 = vst [vmem:[%s1859_s23 + $0x70] sm:$0xff] %v728_v31  ;;  %v654_v12 = vmul.f32 %v1795_v36, %v592_v18  ;;  %v655_v44 = vmul.f32 %v1797_v40, %v593_v19  ;;  %v656_v13 = vmul.f32 %v1799_v7, %v594_v54  ;;  %v657_v27 = vmul.f32 %v1801_v25, %v595_v29  ;;  %v2175_v19 = vld [vmem:[#allocation24_spill] sm:$0xff] }
 0x15a   : > { %777 = vst [vmem:[%s1859_s23 + $0x78] sm:$0xff] %v729_v52  ;;  %v714_v58 = vadd.f32 %v1803_v22, %v652_v59  ;;  %v715_v1 = vadd.f32 %v1805_v51, %v653_v61  ;;  %v569_v63 = vsel %vm568_vm9, %v1814_v39, %v565_v17  ;;  %v542_v31 = vmul.f32 %v1843_v37, %v541_v24 }
 0x15b   : > { %778 = vst [vmem:[%s1859_s23 + $0x80] sm:$0xff] %v730_v34  ;;  %v716_v53 = vadd.f32 %v1807_v57, %v654_v12  ;;  %v717_v20 = vadd.f32 %v1811_v47, %v655_v44  ;;  %v718_v50 = vadd.f32 %v1816_v62, %v656_v13  ;;  %v719_v42 = vadd.f32 %v1818_v10, %v657_v27  ;;  %v486_v12 = vpop.xlane.xlu2 %485  ;;  %v493_v27 = vpop.xlane.xlu0 %492 }
 0x15c   : > { %779 = vst [vmem:[%s1859_s23 + $0x88] sm:$0xff] %v731_v26  ;;  %v620_v52 = vmul.f32 %v569_v63, %v1610_v8  ;;  %v621_v18 = vmul.f32 %v569_v63, %v2174_v32  ;;  %v622_v39 = vmul.f32 %v569_v63, %v2175_v19  ;;  %v623_v54 = vmul.f32 %v569_v63, %v1623_v38 }
 0x15d   : > { %762 = vst [vmem:[%s1859_s23] sm:$0xff] %v714_v58  ;;  %v624_v34 = vmul.f32 %v569_v63, %v1626_v21  ;;  %v625_v29 = vmul.f32 %v569_v63, %v1637_v30  ;;  %v543_v59 = vmul.f32 0.5, %v542_v31  ;;  %vm547_vm10 = vweird.f32 %v1843_v37 }
 0x15e   : > { %763 = vst [vmem:[%s1859_s23 + $0x8] sm:$0xff] %v715_v1  ;;  %v682_v26 = vmul.f32 %v1790_v4, %v620_v52  ;;  %v683_v8 = vmul.f32 %v1793_v15, %v621_v18  ;;  %v684_v61 = vmul.f32 %v1795_v36, %v622_v39  ;;  %v685_v17 = vmul.f32 %v1797_v40, %v623_v54  ;;  %vm548_vm13 = vmor %vm546_vm11, %vm547_vm10 }
 0x15f   : > { %764 = vst [vmem:[%s1859_s23 + $0x10] sm:$0xff] %v716_v53  ;;  %v686_v38 = vmul.f32 %v1799_v7, %v624_v34  ;;  %v687_v21 = vmul.f32 %v1801_v25, %v625_v29  ;;  %v544_v30 = vsub.f32 1.5, %v543_v59  ;;  %v521_v24 = vmul.f32 %v1849_v56, %v1822_v49 }
 0x160   : > { %765 = vst [vmem:[%s1859_s23 + $0x18] sm:$0xff] %v717_v20  ;;  %v744_v44 = vadd.f32 %v1803_v22, %v682_v26  ;;  %v745_v13 = vadd.f32 %v1805_v51, %v683_v8  ;;  %v746_v58 = vadd.f32 %v1807_v57, %v684_v61  ;;  %v747_v1 = vadd.f32 %v1811_v47, %v685_v17 }
 0x161   : > { %766 = vst [vmem:[%s1859_s23 + $0x20] sm:$0xff] %v718_v50  ;;  %v545_v63 = vmul.f32 %v1843_v37, %v544_v30  ;;  %v522_v31 = vmul.f32 %v1849_v56, %v521_v24  ;;  %v748_v53 = vadd.f32 %v1816_v62, %v686_v38  ;;  %v749_v20 = vadd.f32 %v1818_v10, %v687_v21 }
 0x162   : > { %767 = vst [vmem:[%s1859_s23 + $0x28] sm:$0xff] %v719_v42  ;;  %vm527_vm14 = vweird.f32 %v1849_v56  ;;  %v500_v60 = vmul.f32 %v486_v12, %v1526_v33  ;;  %v498_v42 = vmul.f32 %v1855_v9, %v1526_v33  ;;  %v501_v32 = vmul.f32 %v493_v27, %v1526_v33 }
 0x163   : > { %792 = vst [vmem:[%s1859_s23 + $0xf0] sm:$0xff] %v744_v44  ;;  %v549_v50 = vsel %vm548_vm13, %v1843_v37, %v545_v63  ;;  %v523_v52 = vmul.f32 0.5, %v522_v31  ;;  %vm528_vm15 = vmor %vm526_vm12, %vm527_vm14 }
 0x164   : > { %793 = vst [vmem:[%s1859_s23 + $0xf8] sm:$0xff] %v745_v13  ;;  %v608_v18 = vmul.f32 %v549_v50, %v1642_v3  ;;  %v609_v19 = vmul.f32 %v549_v50, %v1645_v14  ;;  %v610_v39 = vmul.f32 %v549_v50, %v1649_v0  ;;  %v611_v54 = vmul.f32 %v549_v50, %v1652_v46 }
 0x165   : > { %794 = vst [vmem:[%s1859_s23 + $0x100] sm:$0xff] %v746_v58  ;;  %v612_v37 = vmul.f32 %v549_v50, %v1661_v55  ;;  %v613_v34 = vmul.f32 %v549_v50, %v1670_v45  ;;  %v524_v29 = vsub.f32 1.5, %v523_v52  ;;  %v1940_v9 = vadd.f32 1e-05, %v500_v60 }
 0x166   : > { %795 = vst [vmem:[%s1859_s23 + $0x108] sm:$0xff] %v747_v1  ;;  %v670_v33 = vmul.f32 %v1790_v4, %v608_v18  ;;  %v671_v3 = vmul.f32 %v1793_v15, %v609_v19  ;;  %v672_v14 = vmul.f32 %v1795_v36, %v610_v39  ;;  %v673_v0 = vmul.f32 %v1797_v40, %v611_v54 }
 0x167   : > { %796 = vst [vmem:[%s1859_s23 + $0x110] sm:$0xff] %v748_v53  ;;  %v674_v46 = vmul.f32 %v1799_v7, %v612_v37  ;;  %v675_v55 = vmul.f32 %v1801_v25, %v613_v34  ;;  %v525_v45 = vmul.f32 %v1849_v56, %v524_v29  ;;  %1023 = vrsqrt.f32 %v1940_v9 }
 0x168   : > { %797 = vst [vmem:[%s1859_s23 + $0x118] sm:$0xff] %v749_v20  ;;  %v732_v59 = vadd.f32 %v1803_v22, %v670_v33  ;;  %v733_v26 = vadd.f32 %v1805_v51, %v671_v3  ;;  %v734_v8 = vadd.f32 %v1807_v57, %v672_v14  ;;  %v735_v61 = vadd.f32 %v1811_v47, %v673_v0 }
 0x169   : > { %v736_v17 = vadd.f32 %v1816_v62, %v674_v46  ;;  %v737_v38 = vadd.f32 %v1818_v10, %v675_v55  ;;  %v529_v21 = vsel %vm528_vm15, %v1849_v56, %v525_v45  ;;  %v1972_v27 = vadd.f32 1e-05, %v498_v42  ;;  %v2176_v45 = vld [vmem:[#allocation26_spill] sm:$0xff] }
 0x16a   : > { %780 = vst [vmem:[%s1859_s23 + $0x90] sm:$0xff] %v732_v59  ;;  %v596_v30 = vmul.f32 %v529_v21, %v1675_v23  ;;  %v597_v24 = vmul.f32 %v529_v21, %v1678_v2  ;;  %v598_v12 = vmul.f32 %v529_v21, %v1681_v11  ;;  %v599_v49 = vmul.f32 %v529_v21, %v1685_v16 }
 0x16b   : > { %781 = vst [vmem:[%s1859_s23 + $0x98] sm:$0xff] %v733_v26  ;;  %v600_v44 = vmul.f32 %v529_v21, %v1688_v6  ;;  %v601_v13 = vmul.f32 %v529_v21, %v1706_v48  ;;  %v1974_v56 = vadd.f32 1e-05, %v501_v32  ;;  %1025 = vrsqrt.f32 %v1972_v27 }
 0x16c   : > { %782 = vst [vmem:[%s1859_s23 + $0xa0] sm:$0xff] %v734_v8  ;;  %v658_v23 = vmul.f32 %v1790_v4, %v596_v30  ;;  %v659_v2 = vmul.f32 %v1793_v15, %v597_v24  ;;  %v660_v11 = vmul.f32 %v1795_v36, %v598_v12  ;;  %v661_v16 = vmul.f32 %v1797_v40, %v599_v49 }
 0x16d   : > { %v1024_v58 = vpop.eup %1023  ;;  %783 = vst [vmem:[%s1859_s23 + $0xa8] sm:$0xff] %v735_v61  ;;  %v662_v6 = vmul.f32 %v1799_v7, %v600_v44  ;;  %v663_v48 = vmul.f32 %v1801_v25, %v601_v13  ;;  %1027 = vrsqrt.f32 %v1974_v56  ;;  %vm576_vm1 = vweird.f32 %v1940_v9 }
 0x16e   : > { %784 = vst [vmem:[%s1859_s23 + $0xb0] sm:$0xff] %v736_v17  ;;  %v720_v1 = vadd.f32 %v1803_v22, %v658_v23  ;;  %v721_v63 = vadd.f32 %v1805_v51, %v659_v2  ;;  %v722_v31 = vadd.f32 %v1807_v57, %v660_v11  ;;  %v723_v53 = vadd.f32 %v1811_v47, %v661_v16  ;;  %v2177_v23 = vld [vmem:[#allocation12_spill] sm:$0xff]  ;;  %v2178_v11 = vld [vmem:[#allocation17_spill] sm:$0xff] }
 0x16f   : > { %785 = vst [vmem:[%s1859_s23 + $0xb8] sm:$0xff] %v737_v38  ;;  %v571_v20 = vmul.f32 %v1024_v58, %v1940_v9  ;;  %v724_v60 = vadd.f32 %v1816_v62, %v662_v6  ;;  %v725_v50 = vadd.f32 %v1818_v10, %v663_v48  ;;  %vm577_vm0 = vweird.f32 %v1024_v58  ;;  %v2180_v48 = vld [vmem:[#allocation21_spill] sm:$0xff] }
 0x170   : > { %768 = vst [vmem:[%s1859_s23 + $0x30] sm:$0xff] %v720_v1  ;;  %vm578_vm2 = vmor %vm576_vm1, %vm577_vm0  ;;  %vm556_vm3 = vweird.f32 %v1972_v27  ;;  %vm586_vm7 = vweird.f32 %v1974_v56  ;;  %v2181_v1 = vld [vmem:[#allocation22_spill] sm:$0xff] }
 0x171   : > { %769 = vst [vmem:[%s1859_s23 + $0x38] sm:$0xff] %v721_v63  ;;  %v572_v52 = vmul.f32 %v1024_v58, %v571_v20  ;;  %v1026_v42 = vpop.eup %1025 }
 0x172   : > { %770 = vst [vmem:[%s1859_s23 + $0x40] sm:$0xff] %v722_v31  ;;  %v551_v18 = vmul.f32 %v1026_v42, %v1972_v27  ;;  %vm557_vm4 = vweird.f32 %v1026_v42  ;;  %v2182_v31 = vld [vmem:[#allocation25_spill] sm:$0xff] }
 0x173   : > { %771 = vst [vmem:[%s1859_s23 + $0x48] sm:$0xff] %v723_v53  ;;  %v573_v32 = vmul.f32 0.5, %v572_v52  ;;  %v1028_v39 = vpop.eup %1027  ;;  %vm558_vm6 = vmor %vm556_vm3, %vm557_vm4 }
 0x174   : > { %772 = vst [vmem:[%s1859_s23 + $0x50] sm:$0xff] %v724_v60  ;;  %v552_v54 = vmul.f32 %v1026_v42, %v551_v18  ;;  %v581_v34 = vmul.f32 %v1028_v39, %v1974_v56  ;;  %vm587_vm5 = vweird.f32 %v1028_v39 }
 0x175   : > { %773 = vst [vmem:[%s1859_s23 + $0x58] sm:$0xff] %v725_v50  ;;  %v574_v19 = vsub.f32 1.5, %v573_v32  ;;  %vm588_vm8 = vmor %vm586_vm7, %vm587_vm5 }
 0x176   : > { %v553_v29 = vmul.f32 0.5, %v552_v54  ;;  %v582_v3 = vmul.f32 %v1028_v39, %v581_v34 }
 0x177   : > { %v575_v37 = vmul.f32 %v1024_v58, %v574_v19  ;;  %v2183_v19 = vld [vmem:[#allocation27_spill] sm:$0xff] }
 0x178   : > { %v554_v26 = vsub.f32 1.5, %v553_v29  ;;  %v583_v8 = vmul.f32 0.5, %v582_v3 }
 0x179   : > { %v579_v33 = vsel %vm578_vm2, %v1024_v58, %v575_v37  ;;  %v2179_v58 = vld [vmem:[#allocation20_spill] sm:$0xff] }
 0x17a   : > { %v626_v14 = vmul.f32 %v579_v33, %v1713_v35  ;;  %v627_v0 = vmul.f32 %v579_v33, %v1716_v41  ;;  %v628_v46 = vmul.f32 %v579_v33, %v1721_v28  ;;  %v629_v55 = vmul.f32 %v579_v33, %v1724_v5  ;;  %v2184_v37 = vld [vmem:[#allocation28_spill] sm:$0xff] }
 0x17b   : > { %v630_v9 = vmul.f32 %v579_v33, %v1727_v43  ;;  %v631_v59 = vmul.f32 %v579_v33, %v2176_v45  ;;  %v555_v5 = vmul.f32 %v1026_v42, %v554_v26  ;;  %v584_v21 = vsub.f32 1.5, %v583_v8  ;;  %v2187_v45 = vld [vmem:[#allocation31_spill] sm:$0xff]  ;;  %v2188_v26 = vld [vmem:[#allocation32_spill] sm:$0xff] }
 0x17c   : > { %v688_v61 = vmul.f32 %v1790_v4, %v626_v14  ;;  %v689_v17 = vmul.f32 %v1793_v15, %v627_v0  ;;  %v690_v38 = vmul.f32 %v1795_v36, %v628_v46  ;;  %v691_v35 = vmul.f32 %v1797_v40, %v629_v55  ;;  %v2185_v0 = vld [vmem:[#allocation29_spill] sm:$0xff]  ;;  %v2186_v55 = vld [vmem:[#allocation30_spill] sm:$0xff] }
 0x17d   : > { %v692_v41 = vmul.f32 %v1799_v7, %v630_v9  ;;  %v693_v28 = vmul.f32 %v1801_v25, %v631_v59  ;;  %v559_v44 = vsel %vm558_vm6, %v1026_v42, %v555_v5  ;;  %v585_v13 = vmul.f32 %v1028_v39, %v584_v21 }
 0x17e   : > { %v750_v43 = vadd.f32 %v1803_v22, %v688_v61  ;;  %v751_v30 = vadd.f32 %v1805_v51, %v689_v17  ;;  %v752_v24 = vadd.f32 %v1807_v57, %v690_v38  ;;  %v753_v12 = vadd.f32 %v1811_v47, %v691_v35 }
 0x17f   : > { %v754_v49 = vadd.f32 %v1816_v62, %v692_v41  ;;  %v614_v2 = vmul.f32 %v559_v44, %v2177_v23  ;;  %v615_v16 = vmul.f32 %v559_v44, %v2178_v11  ;;  %v616_v6 = vmul.f32 %v559_v44, %v2179_v58 }
 0x180   : > { %798 = vst [vmem:[%s1859_s23 + $0x120] sm:$0xff] %v750_v43  ;;  %v617_v27 = vmul.f32 %v559_v44, %v2180_v48  ;;  %v755_v56 = vadd.f32 %v1818_v10, %v693_v28  ;;  %v618_v63 = vmul.f32 %v559_v44, %v2181_v1  ;;  %v619_v53 = vmul.f32 %v559_v44, %v2182_v31 }
 0x181   : > { %799 = vst [vmem:[%s1859_s23 + $0x128] sm:$0xff] %v751_v30  ;;  %v589_v20 = vsel %vm588_vm8, %v1028_v39, %v585_v13  ;;  %v676_v60 = vmul.f32 %v1790_v4, %v614_v2  ;;  %v677_v50 = vmul.f32 %v1793_v15, %v615_v16  ;;  %v678_v52 = vmul.f32 %v1795_v36, %v616_v6 }
 0x182   : > { %800 = vst [vmem:[%s1859_s23 + $0x130] sm:$0xff] %v752_v24  ;;  %v679_v42 = vmul.f32 %v1797_v40, %v617_v27  ;;  %v680_v32 = vmul.f32 %v1799_v7, %v618_v63  ;;  %v681_v18 = vmul.f32 %v1801_v25, %v619_v53  ;;  %v632_v54 = vmul.f32 %v589_v20, %v2183_v19 }
 0x183   : > { %801 = vst [vmem:[%s1859_s23 + $0x138] sm:$0xff] %v753_v12  ;;  %v633_v39 = vmul.f32 %v589_v20, %v2184_v37  ;;  %v738_v34 = vadd.f32 %v1803_v22, %v676_v60  ;;  %v739_v29 = vadd.f32 %v1805_v51, %v677_v50  ;;  %v740_v33 = vadd.f32 %v1807_v57, %v678_v52 }
 0x184   : > { %802 = vst [vmem:[%s1859_s23 + $0x140] sm:$0xff] %v754_v49  ;;  %v741_v3 = vadd.f32 %v1811_v47, %v679_v42  ;;  %v742_v14 = vadd.f32 %v1816_v62, %v680_v32  ;;  %v634_v46 = vmul.f32 %v589_v20, %v2185_v0  ;;  %v635_v9 = vmul.f32 %v589_v20, %v2186_v55 }
 0x185   : > { %803 = vst [vmem:[%s1859_s23 + $0x148] sm:$0xff] %v755_v56  ;;  %v636_v59 = vmul.f32 %v589_v20, %v2187_v45  ;;  %v637_v8 = vmul.f32 %v589_v20, %v2188_v26  ;;  %v694_v61 = vmul.f32 %v1790_v4, %v632_v54  ;;  %v695_v17 = vmul.f32 %v1793_v15, %v633_v39 }
 0x186   : > { %786 = vst [vmem:[%s1859_s23 + $0xc0] sm:$0xff] %v738_v34  ;;  %v743_v38 = vadd.f32 %v1818_v10, %v681_v18  ;;  %v696_v35 = vmul.f32 %v1795_v36, %v634_v46  ;;  %v697_v41 = vmul.f32 %v1797_v40, %v635_v9 }
 0x187   : > { %787 = vst [vmem:[%s1859_s23 + $0xc8] sm:$0xff] %v739_v29  ;;  %v698_v28 = vmul.f32 %v1799_v7, %v636_v59  ;;  %v756_v5 = vadd.f32 %v1803_v22, %v694_v61  ;;  %v699_v4 = vmul.f32 %v1801_v25, %v637_v8  ;;  %v757_v15 = vadd.f32 %v1805_v51, %v695_v17 }
 0x188   : > { %788 = vst [vmem:[%s1859_s23 + $0xd0] sm:$0xff] %v740_v33  ;;  %v758_v36 = vadd.f32 %v1807_v57, %v696_v35  ;;  %v759_v40 = vadd.f32 %v1811_v47, %v697_v41 }
 0x189   : > { %789 = vst [vmem:[%s1859_s23 + $0xd8] sm:$0xff] %v741_v3  ;;  %v760_v7 = vadd.f32 %v1816_v62, %v698_v28  ;;  %v761_v22 = vadd.f32 %v1818_v10, %v699_v4 }
 0x18a   : > { %790 = vst [vmem:[%s1859_s23 + $0xe0] sm:$0xff] %v742_v14 }
 0x18b   : > { %791 = vst [vmem:[%s1859_s23 + $0xe8] sm:$0xff] %v743_v38 }
 0x18c   : > { %804 = vst [vmem:[%s1859_s23 + $0x150] sm:$0xff] %v756_v5 }
 0x18d   : > { %805 = vst [vmem:[%s1859_s23 + $0x158] sm:$0xff] %v757_v15 }
 0x18e   : > { %806 = vst [vmem:[%s1859_s23 + $0x160] sm:$0xff] %v758_v36 }
 0x18f   : > { %807 = vst [vmem:[%s1859_s23 + $0x168] sm:$0xff] %v759_v40 }
 0x190   : > { %808 = vst [vmem:[%s1859_s23 + $0x170] sm:$0xff] %v760_v7 }
 0x191   : > { %809 = vst [vmem:[%s1859_s23 + $0x178] sm:$0xff] %v761_v22 }
 0x192   : > { %1146 = shalt.err (!%p1143_p8)
}
 0x193   : > { %s1196_s27 = smov 768   ;;  %s1197_s28 = smov 48  }
 0x194   : > { %949 = dma.vmem_to_hbm [thread:$0]  (%p1270_p11), %s825_s29, 6144, %s827_s22, %s811_s6, %s1196_s27, %s1196_s27, %s1197_s28  }
 0x195 PF: > { %s841_s30 = sand.u32 1, %s1177_s12   ;;  %p2189_p9 = scmp.ge.s32.totalorder %s1189_s15, 2 }
 0x196   : > { %s842_s4 = scalar_lea.sflag [#allocation4], %s841_s30 }
 0x197   : > { %p963_p10 = pnand %p2189_p9, %p1274_p12 }
 0x199   : > { %p964_p1 = pneg %p963_p10 }
 0x19b   : > { %1172 = dma.done.wait (%p964_p1), %s842_s4, 6144  }
 0x19c   : > { %1174 = vsyncadd (%p964_p1), %s842_s4, 4294961152  ;;  %p17_p2 = scmp.ge.s32.totalorder %s1243_s18, 4   ;;  %s2190_s12 = smov %s1181_s13 }
 0x19d   : > { %s2191_s13 = smov %s1185_s14  ;;  %s2192_s14 = smov %s1255_s21 }
 0x19e   : > { %s2193_s15 = smov %s1243_s18  ;;  %19 = sbr.rel (!%p17_p2) target bundleno = 6 (0x6), region = 85 }
 0x1a3   :  { %848 = vsyncpa [#allocation3], 1 }
 0x1a4   :  { %850 = vsyncpa [#allocation3 + $0x1], 1 }
 0x1a5   :  { %851 = vsyncpa [#allocation6], 1 }
 0x1a6   :  { %852 = vsyncpa [#allocation4], 1 }
 0x1a7   :  { %854 = vsyncpa [#allocation4 + $0x1], 1 }

</bundles_post_ra>
